<compile_context>
chip_gen: v7x
topology: tpu7x:2x2x1
jax: 0.10.0
libtpu: 0.0.40
codegen_flags: <defaults>
</compile_context>

<pallas_src>
import jax
import jax.numpy as jnp
from jax.experimental import pallas as pl
from jax.experimental.pallas import tpu as pltpu

LANE = 128


def _round_up(x, m):
    return ((x + m - 1) // m) * m


def dqn_fcnet_kernel(x_ref,
                     w1_ref, b1_ref,
                     w2_ref, b2_ref,
                     wh_ref, bh_ref,
                     out_ref):
    """One batch-tile: two ReLU hidden layers + one fused (trick|meld) head matmul."""
    x = x_ref[...]

    # fc_1 + ReLU
    h = jnp.dot(x, w1_ref[...], preferred_element_type=jnp.float32) + b1_ref[...]
    h = jnp.maximum(h, 0.0)

    # fc_2 + ReLU
    h = jnp.dot(h, w2_ref[...], preferred_element_type=jnp.float32) + b2_ref[...]
    h = jnp.maximum(h, 0.0)

    # fused heads (trick | meld | zero-padding), single lane-dense store
    out_ref[...] = jnp.dot(h, wh_ref[...], preferred_element_type=jnp.float32) + bh_ref[...]


def prepare_params(params):
    """Fuse the two heads and zero-pad hidden / output lane dims to multiples of 128.

    Padding is mathematically inert: padded hidden units have zero incoming weights and
    zero bias (ReLU(0)=0) and zero outgoing weights; padded output lanes are sliced off.
    Do this ONCE outside the hot path.
    """
    w1, b1, w2, b2, wt, bt, wm, bm = params
    S, H = w1.shape
    A = wt.shape[1]

    Hp = max(LANE, _round_up(H, LANE))
    Pout = max(LANE, _round_up(2 * A, LANE))

    wh = jnp.concatenate([wt, wm], axis=1)   # [H, 2A]
    bh = jnp.concatenate([bt, bm], axis=1)   # [1, 2A]

    w1p = jnp.pad(w1, ((0, 0), (0, Hp - H)))
    b1p = jnp.pad(b1, ((0, 0), (0, Hp - H)))
    w2p = jnp.pad(w2, ((0, Hp - H), (0, Hp - H)))
    b2p = jnp.pad(b2, ((0, 0), (0, Hp - H)))
    whp = jnp.pad(wh, ((0, Hp - H), (0, Pout - 2 * A)))
    bhp = jnp.pad(bh, ((0, 0), (0, Pout - 2 * A)))

    return (w1p, b1p, w2p, b2p, whp, bhp), A


def dqn_fcnet_forward(states, prepared, num_actions, *, batch_tile=None):
    """Tiles the batch dimension; all (small, padded) weights stay resident per tile."""
    w1, b1, w2, b2, wh, bh = prepared
    B, S = states.shape
    Pout = wh.shape[1]
    A = num_actions

    if batch_tile is None:
        # Large tiles amortize the ~0.35us/grid-step overhead and fill MXU rows;
        # keep at least 2 grid steps when B allows so v7x can use both TensorCores.
        batch_tile = B if B <= 128 else min(256, B // 2)
    assert B % batch_tile == 0, "batch must be divisible by batch_tile"
    grid = (B // batch_tile,)

    def param_spec(shape):
        # Grid-invariant full-array block.
        return pl.BlockSpec(shape, lambda i: (0, 0))

    fused = pl.pallas_call(
        dqn_fcnet_kernel,
        out_shape=jax.ShapeDtypeStruct((B, Pout), jnp.float32),
        grid_spec=pltpu.PrefetchScalarGridSpec(
            num_scalar_prefetch=0,
            grid=grid,
            in_specs=[
                pl.BlockSpec((batch_tile, S), lambda i: (i, 0)),   # states tile
                param_spec(w1.shape), param_spec(b1.shape),
                param_spec(w2.shape), param_spec(b2.shape),
                param_spec(wh.shape), param_spec(bh.shape),
            ],
            out_specs=pl.BlockSpec((batch_tile, Pout), lambda i: (i, 0)),
        ),
        compiler_params=pltpu.CompilerParams(
            dimension_semantics=("parallel",),
        ),
    )(states, w1, b1, w2, b2, wh, bh)

    # Split fused lane-dense slab back into the two heads.
    return fused[:, :A], fused[:, A:2 * A]


def init_params(key, state_size, hidden, num_actions):
    """weights ~ N(0, 0.02), biases = 0 — mirrors weights_init() in the PyTorch module.

    Weights stored transposed vs. PyTorch (shape [in_features, out_features]) so each
    layer is y = x @ W + b.
    """
    ks = jax.random.split(key, 4)
    std = 0.02
    w1 = std * jax.random.normal(ks[0], (state_size, hidden), jnp.float32)
    b1 = jnp.zeros((1, hidden), jnp.float32)
    w2 = std * jax.random.normal(ks[1], (hidden, hidden), jnp.float32)
    b2 = jnp.zeros((1, hidden), jnp.float32)
    wt = std * jax.random.normal(ks[2], (hidden, num_actions), jnp.float32)
    bt = jnp.zeros((1, num_actions), jnp.float32)
    wm = std * jax.random.normal(ks[3], (hidden, num_actions), jnp.float32)
    bm = jnp.zeros((1, num_actions), jnp.float32)
    return (w1, b1, w2, b2, wt, bt, wm, bm)


def reference_forward(states, params):
    """Pure-JAX reference for the same forward pass (unpadded, unfused)."""
    w1, b1, w2, b2, wt, bt, wm, bm = params
    h = jnp.maximum(states @ w1 + b1, 0.0)
    h = jnp.maximum(h @ w2 + b2, 0.0)
    return h @ wt + bt, h @ wm + bm


if __name__ == "__main__":
    # Module hyperparameters implied by __init__:
    #   num_layers=3, hidden_units_per_layer=64, state_size=32, num_actions=16
    # Batch of 256 so the tiled kernel exercises a 2-step parallel grid (128 rows/tile).
    B, S, H, A = 256, 32, 64, 16

    key = jax.random.PRNGKey(0)
    k_x, k_p = jax.random.split(key)
    states = jax.random.normal(k_x, (B, S), jnp.float32)
    params = init_params(k_p, S, H, A)

    prepared, num_actions = prepare_params(params)
    trick_q, meld_q = dqn_fcnet_forward(states, prepared, num_actions, batch_tile=128)
    jax.block_until_ready((trick_q, meld_q))

    trick_ref, meld_ref = reference_forward(states, params)
    assert trick_q.shape == (B, A) and meld_q.shape == (B, A)
    assert jnp.allclose(trick_q, trick_ref, atol=1e-5, rtol=1e-5)
    assert jnp.allclose(meld_q, meld_ref, atol=1e-5, rtol=1e-5)

    print("KERNEL_OK")
</pallas_src>

<mosaic_0001>
module attributes {stable_mosaic.version = 11 : i64} {
  func.func @dqn_fcnet_kernel(%arg0: i32, %arg1: memref<128x32xf32, #tpu.memory_space<vmem>>, %arg2: memref<32x128xf32, #tpu.memory_space<vmem>>, %arg3: memref<1x128xf32, #tpu.memory_space<vmem>>, %arg4: memref<128x128xf32, #tpu.memory_space<vmem>>, %arg5: memref<1x128xf32, #tpu.memory_space<vmem>>, %arg6: memref<128x128xf32, #tpu.memory_space<vmem>>, %arg7: memref<1x128xf32, #tpu.memory_space<vmem>>, %arg8: memref<128x128xf32, #tpu.memory_space<vmem>>) attributes {dimension_semantics = [#tpu.dimension_semantics<parallel>], iteration_bounds = array<i64: 2>, scalar_prefetch = 0 : i64, scratch_operands = 0 : i64, tpu.core_type = #tpu.core_type<tc>, window_params = [{transform_indices = @transform_0, window_bounds = array<i64: 128, 32>}, {pipeline_mode = #tpu.pipeline_mode<synchronous>, transform_indices = @transform_1, window_bounds = array<i64: 32, 128>}, {pipeline_mode = #tpu.pipeline_mode<synchronous>, transform_indices = @transform_2, window_bounds = array<i64: 1, 128>}, {pipeline_mode = #tpu.pipeline_mode<synchronous>, transform_indices = @transform_3, window_bounds = array<i64: 128, 128>}, {pipeline_mode = #tpu.pipeline_mode<synchronous>, transform_indices = @transform_4, window_bounds = array<i64: 1, 128>}, {pipeline_mode = #tpu.pipeline_mode<synchronous>, transform_indices = @transform_5, window_bounds = array<i64: 128, 128>}, {pipeline_mode = #tpu.pipeline_mode<synchronous>, transform_indices = @transform_6, window_bounds = array<i64: 1, 128>}, {transform_indices = @transform_7, window_bounds = array<i64: 128, 128>}]} {
    %c0 = arith.constant 0 : index
    %c0_0 = arith.constant 0 : index
    %0 = vector.load %arg1[%c0, %c0_0] : memref<128x32xf32, #tpu.memory_space<vmem>>, vector<128x32xf32>
    %c0_1 = arith.constant 0 : index
    %c0_2 = arith.constant 0 : index
    %1 = vector.load %arg2[%c0_1, %c0_2] : memref<32x128xf32, #tpu.memory_space<vmem>>, vector<32x128xf32>
    %cst = arith.constant dense<0.000000e+00> : vector<128x128xf32>
    %2 = tpu.matmul %0, %1, %cst {dimension_numbers = #tpu.dot_dimension_numbers<[1], [0], [0], [1], [0, 0, 1, 1], [], []>} : vector<128x32xf32>, vector<32x128xf32>, vector<128x128xf32> -> vector<128x128xf32>
    %c0_3 = arith.constant 0 : index
    %c0_4 = arith.constant 0 : index
    %3 = vector.load %arg3[%c0_3, %c0_4] : memref<1x128xf32, #tpu.memory_space<vmem>>, vector<1x128xf32>
    %4 = vector.broadcast %3 : vector<1x128xf32> to vector<128x128xf32>
    %5 = arith.addf %2, %4 : vector<128x128xf32>
    %cst_5 = arith.constant 0.000000e+00 : f32
    %6 = vector.broadcast %cst_5 : f32 to vector<128x128xf32>
    %7 = arith.maximumf %5, %6 : vector<128x128xf32>
    %c0_6 = arith.constant 0 : index
    %c0_7 = arith.constant 0 : index
    %8 = vector.load %arg4[%c0_6, %c0_7] : memref<128x128xf32, #tpu.memory_space<vmem>>, vector<128x128xf32>
    %cst_8 = arith.constant dense<0.000000e+00> : vector<128x128xf32>
    %9 = tpu.matmul %7, %8, %cst_8 {dimension_numbers = #tpu.dot_dimension_numbers<[1], [0], [0], [1], [0, 0, 1, 1], [], []>} : vector<128x128xf32>, vector<128x128xf32>, vector<128x128xf32> -> vector<128x128xf32>
    %c0_9 = arith.constant 0 : index
    %c0_10 = arith.constant 0 : index
    %10 = vector.load %arg5[%c0_9, %c0_10] : memref<1x128xf32, #tpu.memory_space<vmem>>, vector<1x128xf32>
    %11 = vector.broadcast %10 : vector<1x128xf32> to vector<128x128xf32>
    %12 = arith.addf %9, %11 : vector<128x128xf32>
    %cst_11 = arith.constant 0.000000e+00 : f32
    %13 = vector.broadcast %cst_11 : f32 to vector<128x128xf32>
    %14 = arith.maximumf %12, %13 : vector<128x128xf32>
    %c0_12 = arith.constant 0 : index
    %c0_13 = arith.constant 0 : index
    %15 = vector.load %arg6[%c0_12, %c0_13] : memref<128x128xf32, #tpu.memory_space<vmem>>, vector<128x128xf32>
    %cst_14 = arith.constant dense<0.000000e+00> : vector<128x128xf32>
    %16 = tpu.matmul %14, %15, %cst_14 {dimension_numbers = #tpu.dot_dimension_numbers<[1], [0], [0], [1], [0, 0, 1, 1], [], []>} : vector<128x128xf32>, vector<128x128xf32>, vector<128x128xf32> -> vector<128x128xf32>
    %c0_15 = arith.constant 0 : index
    %c0_16 = arith.constant 0 : index
    %17 = vector.load %arg7[%c0_15, %c0_16] : memref<1x128xf32, #tpu.memory_space<vmem>>, vector<1x128xf32>
    %18 = vector.broadcast %17 : vector<1x128xf32> to vector<128x128xf32>
    %19 = arith.addf %16, %18 : vector<128x128xf32>
    %c0_17 = arith.constant 0 : index
    %c0_18 = arith.constant 0 : index
    %20 = vector.load %arg8[%c0_17, %c0_18] : memref<128x128xf32, #tpu.memory_space<vmem>>, vector<128x128xf32>
    tpu.vector_store %arg8[%c0_17, %c0_18], %19 {strides = array<i32>} : memref<128x128xf32, #tpu.memory_space<vmem>>, vector<128x128xf32>,
    return
  }
  func.func @transform_0(%arg0: i32) -> (i32, i32) {
    %c0_i32 = arith.constant 0 : i32
    %c0_i32_0 = arith.constant 0 : i32
    return %arg0, %c0_i32 : i32, i32
  }
  func.func @transform_1(%arg0: i32) -> (i32, i32) {
    %c0_i32 = arith.constant 0 : i32
    %c0_i32_0 = arith.constant 0 : i32
    %c0_i32_1 = arith.constant 0 : i32
    return %c0_i32, %c0_i32_0 : i32, i32
  }
  func.func @transform_2(%arg0: i32) -> (i32, i32) {
    %c0_i32 = arith.constant 0 : i32
    %c0_i32_0 = arith.constant 0 : i32
    %c0_i32_1 = arith.constant 0 : i32
    return %c0_i32, %c0_i32_0 : i32, i32
  }
  func.func @transform_3(%arg0: i32) -> (i32, i32) {
    %c0_i32 = arith.constant 0 : i32
    %c0_i32_0 = arith.constant 0 : i32
    %c0_i32_1 = arith.constant 0 : i32
    return %c0_i32, %c0_i32_0 : i32, i32
  }
  func.func @transform_4(%arg0: i32) -> (i32, i32) {
    %c0_i32 = arith.constant 0 : i32
    %c0_i32_0 = arith.constant 0 : i32
    %c0_i32_1 = arith.constant 0 : i32
    return %c0_i32, %c0_i32_0 : i32, i32
  }
  func.func @transform_5(%arg0: i32) -> (i32, i32) {
    %c0_i32 = arith.constant 0 : i32
    %c0_i32_0 = arith.constant 0 : i32
    %c0_i32_1 = arith.constant 0 : i32
    return %c0_i32, %c0_i32_0 : i32, i32
  }
  func.func @transform_6(%arg0: i32) -> (i32, i32) {
    %c0_i32 = arith.constant 0 : i32
    %c0_i32_0 = arith.constant 0 : i32
    %c0_i32_1 = arith.constant 0 : i32
    return %c0_i32, %c0_i32_0 : i32, i32
  }
  func.func @transform_7(%arg0: i32) -> (i32, i32) {
    %c0_i32 = arith.constant 0 : i32
    %c0_i32_0 = arith.constant 0 : i32
    return %arg0, %c0_i32 : i32, i32
  }
}

</mosaic_0001>

<bundles_post_ra>
// kernel: tpu_custom_call.1
= control target key start
LH: loop header
LB: loop body
LE: loop exit
PB: predicated region body
PF: predicated region fallthrough
CT: control target
= control target key end

     0   :  { %12 = vsyncpa [#allocation3], 0  ;;  %s1775_s0 = inlined_call_operand.vmem [shape: f32[256,32], index: 0, kind: input, shape index: {}]   ;;  %s1776_s1 = inlined_call_operand.vmem [shape: f32[32,128], index: 1, kind: input, shape index: {}]   ;;  %s1777_s2 = inlined_call_operand.vmem [shape: f32[1,128], index: 2, kind: input, shape index: {}]   ;;  %s1778_s3 = inlined_call_operand.vmem [shape: f32[128,128], index: 3, kind: input, shape index: {}]   ;;  %s1779_s4 = inlined_call_operand.vmem [shape: f32[1,128], index: 4, kind: input, shape index: {}]   ;;  %s1780_s5 = inlined_call_operand.vmem [shape: f32[128,128], index: 5, kind: input, shape index: {}]   ;;  %s1781_s6 = inlined_call_operand.vmem [shape: f32[1,128], index: 6, kind: input, shape index: {}]   ;;  %s1782_s7 = inlined_call_operand.hbm [shape: f32[256,128], index: 7, kind: output, shape index: {}]  }
   0x1   :  { %14 = vsyncpa [#allocation3 + $0x1], 0  ;;  %s1457_s24 = smov 0   ;;  %s1459_s25 = smov 0  }
   0x2   :  { %s1461_s26 = smov 0   ;;  %s1463_s27 = smov 0  }
   0x3 LB: > { %s1478_s28 = sadd.s32 4294967295, %s1412_s27   ;;  %s961_s29 = sadd.s32 4294967294, %s1412_s27   ;;  %s1412_s27 = sphi %s1463_s27, %s1788_s27   ;;  %s1408_s26 = sphi %s1461_s26, %s1787_s26   ;;  %s1404_s25 = sphi %s1459_s25, %s1786_s25   ;;  %s1400_s24 = sphi %s1457_s24, %s1785_s24  }
   0x4   : > { %s1482_s30 = sadd.s32 1, %s1412_s27   ;;  %s179_s8 = sadd.s32 1, %s1408_s26 }
   0x5   : > { %s176_s9 = ssub.s32 %s1412_s27, %s1482_s30  ;;  %p189_p0 = scmp.ne.s32.totalorder %s1408_s26, %s1404_s25 }
   0x6   : > { %p177_p1 = scmp.eq.s32.totalorder %s176_s9, 0  ;;  %p190_p2 = scmp.eq.s32.totalorder %s1478_s28, 1 }
   0x7   : > { %p195_p3 = scmp.ne.s32.totalorder %s1404_s25, %s1400_s24  ;;  %p196_p4 = scmp.eq.s32.totalorder %s961_s29, 1 }
   0x8   : > { %s1493_s10 = scalar_select %p177_p1, %s1408_s26, %s179_s8  }
   0x9   : > { %p1495_p5 = por %p190_p2, %p189_p0  ;;  %p1499_p6 = por %p196_p4, %p195_p3 }
   0xa   : > { %p964_p7 = scmp.ge.s32.totalorder %s1412_s27, 1  ;;  %p241_p8 = scmp.lt.s32.totalorder %s1412_s27, 3 }
   0xc   : > { %p242_p9 = pnand %p964_p7, %p241_p8 }
   0xd   : > { %v296_v0 = vld [vmem:[%s1776_s1] sm:$0xff] (!%p242_p9)  ;;  %v297_v1 = vld [vmem:[%s1776_s1 + $0x8] sm:$0xff] (!%p242_p9)  ;;  %v298_v2 = vld [vmem:[%s1776_s1 + $0x10] sm:$0xff] (!%p242_p9)  ;;  %s966_s19 = sshll.u32 (!%p242_p9), %s1478_s28, 4  ;;  %vm307_vm0 = vcmask (!%p242_p9), 261120   ;;  %s270_s9 = sand.u32 (!%p242_p9), 1, %s1404_s25  }
   0xe   : > { %245 = sbr.rel (%p242_p9) target bundleno = 720 (0x2d0), region = 48  ;;  %v1221_v3 = vpack.c.bf16 (!%p242_p9), %v297_v1, %v296_v0  ;;  %v299_v4 = vld [vmem:[%s1776_s1 + $0x18] sm:$0xff] (!%p242_p9)  ;;  %p274_p10 = scmp.lt.s32.totalorder (!%p242_p9), %s966_s19, 31  ;;  %v517_v5 = vld [vmem:[%s1778_s3] sm:$0xff] (!%p242_p9)  ;;  %v518_v6 = vld [vmem:[%s1778_s3 + $0x8] sm:$0xff] (!%p242_p9) }
   0xf   : > { %v1225_v7 = vpack.c.bf16 (!%p242_p9), %v299_v4, %v298_v2  ;;  %v1229_v8 = vpack.c.bf16 (!%p242_p9), %v518_v6, %v517_v5  ;;  %v519_v9 = vld [vmem:[%s1778_s3 + $0x10] sm:$0xff] (!%p242_p9)  ;;  %v520_v10 = vld [vmem:[%s1778_s3 + $0x18] sm:$0xff] (!%p242_p9)  ;;  %v521_v12 = vld [vmem:[%s1778_s3 + $0x20] sm:$0xff] (!%p242_p9)  ;;  %s992_s16 = sshll.u32 (!%p242_p9), %s1478_s28, 11  ;;  %s1734_s28 = scalar_lea.sflag (!%p242_p9), [#allocation3], %s270_s9 }
  0x10   : > { %1222 = vmatprep.subr.bf16.mxu0 (!%p242_p9), %v1221_v3  ;;  %v1233_v11 = vpack.c.bf16 (!%p242_p9), %v520_v10, %v519_v9  ;;  %v522_v13 = vld [vmem:[%s1778_s3 + $0x28] sm:$0xff] (!%p242_p9)  ;;  %v523_v16 = vld [vmem:[%s1778_s3 + $0x30] sm:$0xff] (!%p242_p9)  ;;  %v524_v17 = vld [vmem:[%s1778_s3 + $0x38] sm:$0xff] (!%p242_p9)  ;;  %s1414_s22 = smov (!%p242_p9), [#allocation2]  }
  0x11   : > { %1224 = vmatpush3.bf16.msra.mxu0 (!%p242_p9), %v1221_v3  ;;  %1230 = vmatprep.subr.bf16.mxu1 (!%p242_p9), %v1229_v8  ;;  %v1237_v14 = vpack.c.bf16 (!%p242_p9), %v522_v13, %v521_v12  ;;  %v1241_v20 = vpack.c.bf16 (!%p242_p9), %v524_v17, %v523_v16  ;;  %v525_v21 = vld [vmem:[%s1778_s3 + $0x40] sm:$0xff] (!%p242_p9)  ;;  %v526_v22 = vld [vmem:[%s1778_s3 + $0x48] sm:$0xff] (!%p242_p9)  ;;  %v527_v26 = vld [vmem:[%s1778_s3 + $0x50] sm:$0xff] (!%p242_p9)  ;;  %s1354_s23 = sshll.u32 (!%p242_p9), %s1414_s22, 4  ;;  %s1355_s23 = int_to_ptr.vmem [resolvable:$false] %s1354_s23 }
  0x12   : > { %1226 = vmatprep.subr.bf16.mxu0 (!%p242_p9), %v1225_v7  ;;  %1232 = vmatpush3.bf16.msra.mxu1 (!%p242_p9), %v1229_v8  ;;  %v1245_v25 = vpack.c.bf16 (!%p242_p9), %v526_v22, %v525_v21  ;;  %v528_v27 = vld [vmem:[%s1778_s3 + $0x58] sm:$0xff] (!%p242_p9)  ;;  %v529_v31 = vld [vmem:[%s1778_s3 + $0x60] sm:$0xff] (!%p242_p9)  ;;  %v530_v32 = vld [vmem:[%s1778_s3 + $0x68] sm:$0xff] (!%p242_p9)  ;;  %s1356_s8 = scalar_lea.vmem (!%p242_p9), %s1355_s23, 4096 }
  0x13   : > { %1234 = vmatprep.subr.bf16.mxu1 (!%p242_p9), %v1233_v11  ;;  %v1249_v30 = vpack.c.bf16 (!%p242_p9), %v528_v27, %v527_v26  ;;  %v1253_v35 = vpack.c.bf16 (!%p242_p9), %v530_v32, %v529_v31  ;;  %v531_v43 = vld [vmem:[%s1778_s3 + $0x70] sm:$0xff] (!%p242_p9)  ;;  %v532_v44 = vld [vmem:[%s1778_s3 + $0x78] sm:$0xff] (!%p242_p9)  ;;  %v701_v46 = vld [vmem:[%s1780_s5] sm:$0xff] (!%p242_p9) }
  0x14   : > { %v1257_v45 = vpack.c.bf16 (!%p242_p9), %v532_v44, %v531_v43  ;;  %v702_v47 = vld [vmem:[%s1780_s5 + $0x8] sm:$0xff] (!%p242_p9)  ;;  %v703_v48 = vld [vmem:[%s1780_s5 + $0x10] sm:$0xff] (!%p242_p9)  ;;  %v704_v50 = vld [vmem:[%s1780_s5 + $0x18] sm:$0xff] (!%p242_p9) }
  0x15   : > { %s1790_s19 = smov (!%p274_p10, %s966_s19), 31  ;;  %1228 = vmatpush3.bf16.msra.mxu0 %v1225_v7  ;;  %v1261_v49 = vpack.c.bf16 %v702_v47, %v701_v46  ;;  %v1265_v51 = vpack.c.bf16 %v704_v50, %v703_v48  ;;  %v705_v52 = vld [vmem:[%s1780_s5 + $0x20] sm:$0xff]  ;;  %v706_v53 = vld [vmem:[%s1780_s5 + $0x28] sm:$0xff]  ;;  %v707_v55 = vld [vmem:[%s1780_s5 + $0x30] sm:$0xff] }
  0x16   : > { %s967_s21 = sshll.u32 %s1790_s19, 3  ;;  %1236 = vmatpush3.bf16.msra.mxu1 %v1233_v11  ;;  %v1269_v54 = vpack.c.bf16 %v706_v53, %v705_v52  ;;  %v708_v56 = vld [vmem:[%s1780_s5 + $0x38] sm:$0xff]  ;;  %v709_v58 = vld [vmem:[%s1780_s5 + $0x40] sm:$0xff]  ;;  %v710_v59 = vld [vmem:[%s1780_s5 + $0x48] sm:$0xff]  ;;  %s965_s19 = sshll.u32 %s270_s9, 7 }
  0x17   : > { %s1539_s29 = scalar_lea.vmem %s1775_s0, %s967_s21  ;;  %1238 = vmatprep.subr.bf16.mxu1 %v1237_v14  ;;  %1262 = vmatprep.subr.bf16.mxu0 %v1261_v49  ;;  %v1627_v57 = vpack.c.bf16 %v708_v56, %v707_v55  ;;  %v1636_v60 = vpack.c.bf16 %v710_v59, %v709_v58  ;;  %v711_v61 = vld [vmem:[%s1780_s5 + $0x50] sm:$0xff]  ;;  %v712_v62 = vld [vmem:[%s1780_s5 + $0x58] sm:$0xff]  ;;  %v713_v0 = vld [vmem:[%s1780_s5 + $0x60] sm:$0xff]  ;;  %s1705_s15 = scalar_lea.vmem [#allocation2], %s965_s19 }
  0x18   : > { %v280_v15 = vld [vmem:[%s1539_s29] sm:$0xff]  ;;  %v281_v18 = vld [vmem:[%s1539_s29 + $0x8] sm:$0xff]  ;;  %v282_v19 = vld [vmem:[%s1539_s29 + $0x10] sm:$0xff]  ;;  %v1646_v63 = vpack.c.bf16 %v712_v62, %v711_v61  ;;  %s899_s17 = sshll.u32 %s1705_s15, 4  ;;  %s1726_s21 = scalar_lea.hbm %s1782_s7, %s992_s16  ;;  %s1728_s17 = int_to_ptr.vmem [resolvable:$true] %s899_s17 }
  0x19   : > { %1085 = vmatprep.mubr.msk.f32.mxu0 %vm307_vm0, %v280_v15  ;;  %v283_v23 = vld [vmem:[%s1539_s29 + $0x18] sm:$0xff]  ;;  %v284_v24 = vld [vmem:[%s1539_s29 + $0x20] sm:$0xff]  ;;  %v285_v28 = vld [vmem:[%s1539_s29 + $0x28] sm:$0xff]  ;;  %p1357_p0 = scmp.lt.s32.totalorder %s1728_s17, %s1355_s23 }
  0x1a   : > { %1086 = vmatmul.mubr.msk.f32.vlgmr.msra.gmra.mrb[0].mxu0 %vm307_vm0, %v281_v18  ;;  %1240 = vmatpush3.bf16.msra.mxu1 %v1237_v14  ;;  %v286_v29 = vld [vmem:[%s1539_s29 + $0x30] sm:$0xff]  ;;  %v287_v33 = vld [vmem:[%s1539_s29 + $0x38] sm:$0xff]  ;;  %v288_v34 = vld [vmem:[%s1539_s29 + $0x40] sm:$0xff] }
  0x1b   : > { %1088 = vmatprep.mubr.msk.f32.mxu0 %vm307_vm0, %v282_v19  ;;  %1242 = vmatprep.subr.bf16.mxu1 %v1241_v20  ;;  %v289_v36 = vld [vmem:[%s1539_s29 + $0x48] sm:$0xff]  ;;  %v290_v37 = vld [vmem:[%s1539_s29 + $0x50] sm:$0xff]  ;;  %v291_v38 = vld [vmem:[%s1539_s29 + $0x58] sm:$0xff] }
  0x1c   : > { %v292_v39 = vld [vmem:[%s1539_s29 + $0x60] sm:$0xff]  ;;  %v293_v40 = vld [vmem:[%s1539_s29 + $0x68] sm:$0xff]  ;;  %v294_v41 = vld [vmem:[%s1539_s29 + $0x70] sm:$0xff]  ;;  %1264 = vmatpush3.bf16.msra.mxu0 %v1261_v49 }
  0x1d   : > { %v295_v42 = vld [vmem:[%s1539_s29 + $0x78] sm:$0xff]  ;;  %1266 = vmatprep.subr.bf16.mxu0 %v1265_v51  ;;  %v714_v1 = vld [vmem:[%s1780_s5 + $0x68] sm:$0xff]  ;;  %v1664_v3 = vld [vmem:[%s1777_s2] ss:$0 sm:$0xff]  ;;  %s1350_s29 = scalar_lea.vmem %s1728_s17, 2048 }
  0x1e   : > { %1089 = vmatmul.mubr.msk.f32.gmra.mrb[2].mxu0 %vm307_vm0, %v283_v23  ;;  %1244 = vmatpush3.bf16.msra.mxu1 %v1241_v20  ;;  %v1656_v2 = vpack.c.bf16 %v714_v1, %v713_v0  ;;  %v715_v52 = vld [vmem:[%s1780_s5 + $0x70] sm:$0xff]  ;;  %v716_v53 = vld [vmem:[%s1780_s5 + $0x78] sm:$0xff]  ;;  %v985_v55 = vld [vmem:[%s1779_s4] ss:$0 sm:$0xff]  ;;  %p1351_p11 = scmp.ne.s32.totalorder %s1728_s17, %s1350_s29  ;;  %p1358_p1 = scmp.lt.s32.totalorder %s1356_s8, %s1350_s29 }
  0x1f   : > { %1091 = vmatprep.mubr.msk.f32.mxu0 %vm307_vm0, %v284_v24  ;;  %1246 = vmatprep.subr.bf16.mxu1 %v1245_v25 }
  0x20   : > { %1268 = vmatpush3.bf16.msra.mxu0 %v1265_v51  ;;  %p1352_p12 = pnand %p1351_p11, %p1495_p5  ;;  %p1359_p2 = por %p1358_p1, %p1357_p0 }
  0x21   : > { %1270 = vmatprep.subr.bf16.mxu0 %v1269_v54 }
  0x22   : > { %1092 = vmatmul.mubr.msk.f32.gmra.mrb[4].mxu0 %vm307_vm0, %v285_v28  ;;  %1248 = vmatpush3.bf16.msra.mxu1 %v1245_v25  ;;  %p1353_p13 = pneg %p1352_p12 }
  0x23   : > { %1094 = vmatprep.mubr.msk.f32.mxu0 %vm307_vm0, %v286_v29  ;;  %1250 = vmatprep.subr.bf16.mxu1 %v1249_v30 }
  0x24   : > { %1272 = vmatpush3.bf16.msra.mxu0 %v1269_v54  ;;  %p1360_p3 = pnand %p1359_p2, %p1353_p13 }
  0x25   : > { %1274 = vmatprep.subr.bf16.mxu0 %v1627_v57 }
  0x26   : > { %1095 = vmatmul.mubr.msk.f32.gmra.mrb[6].mxu0 %vm307_vm0, %v287_v33  ;;  %1252 = vmatpush3.bf16.msra.mxu1 %v1249_v30 }
  0x27   : > { %1097 = vmatprep.mubr.msk.f32.mxu0 %vm307_vm0, %v288_v34  ;;  %1254 = vmatprep.subr.bf16.mxu1 %v1253_v35 }
  0x28   : > { %1276 = vmatpush3.bf16.msra.mxu0 %v1627_v57 }
  0x29   : > { %1278 = vmatprep.subr.bf16.mxu0 %v1636_v60 }
  0x2a   : > { %1098 = vmatmul.mubr.msk.f32.gmra.mrb[8].mxu0 %vm307_vm0, %v289_v36  ;;  %1256 = vmatpush3.bf16.msra.mxu1 %v1253_v35 }
  0x2b   : > { %1100 = vmatprep.mubr.msk.f32.mxu0 %vm307_vm0, %v290_v37  ;;  %1258 = vmatprep.subr.bf16.mxu1 %v1257_v45 }
  0x2c   : > { %1280 = vmatpush3.bf16.msra.mxu0 %v1636_v60 }
  0x2d   : > { %1282 = vmatprep.subr.bf16.mxu0 %v1646_v63 }
  0x2e   : > { %1101 = vmatmul.mubr.msk.f32.gmra.mrb[10].mxu0 %vm307_vm0, %v291_v38  ;;  %1260 = vmatpush3.bf16.msra.mxu1 %v1257_v45 }
  0x2f   : > { %1103 = vmatprep.mubr.msk.f32.mxu0 %vm307_vm0, %v292_v39  ;;  %1293 = vmatprep.subr.bf16.mxu1 %v1261_v49 }
  0x30   : > { %1284 = vmatpush3.bf16.msra.mxu0 %v1646_v63 }
  0x31   : > { %1286 = vmatprep.subr.bf16.mxu0 %v1656_v2 }
  0x32   : > { %1104 = vmatmul.mubr.msk.f32.gmra.mrb[12].mxu0 %vm307_vm0, %v293_v40 }
  0x33   : > { %1106 = vmatprep.mubr.msk.f32.mxu0 %vm307_vm0, %v294_v41 }
  0x34   : > { %1288 = vmatpush3.bf16.msra.mxu0 %v1656_v2 }
  0x36   : > { %1107 = vmatmul.mubr.msk.f32.gmra.mrb[14].mxu0 %vm307_vm0, %v295_v42 }
  0xed   : > { %v1087_v4 = vpop.f32.mrb[0].mxu0 }
  0xee   : > { %v428_v5 = vadd.f32 %v1087_v4, %v1664_v3  ;;  %v422_v6 = vpop.f32.mrb[1].mxu0 }
  0xef   : > { %v423_v7 = vadd.f32 %v1664_v3, %v422_v6 }
  0xf0   : > { %v502_v10 = vmax.f32 %v428_v5, 0.0 }
  0xf1   : > { %v1090_v8 = vpop.f32.mrb[2].mxu0  ;;  %v501_v9 = vmax.f32 %v423_v7, 0.0 }
  0xf2   : > { %v438_v11 = vadd.f32 %v1090_v8, %v1664_v3  ;;  %v432_v12 = vpop.f32.mrb[3].mxu0 }
  0xf3   : > { %v433_v13 = vadd.f32 %v1664_v3, %v432_v12  ;;  %1141 = vmatprep.mubr.f32.mxu1 %v501_v9 }
  0xf4   : > { %1142 = vmatmul.mubr.f32.vlgmr.msra.gmra.mrb[0].mxu1 %v502_v10  ;;  %v504_v16 = vmax.f32 %v438_v11, 0.0 }
  0xf5   : > { %v503_v14 = vmax.f32 %v433_v13, 0.0  ;;  %v1093_v15 = vpop.f32.mrb[4].mxu0  ;;  %1301 = vmatpush3.bf16.msra.mxu1 %v1261_v49 }
  0xf6   : > { %v448_v17 = vadd.f32 %v1093_v15, %v1664_v3  ;;  %v442_v18 = vpop.f32.mrb[5].mxu0  ;;  %1294 = vmatprep.subr.bf16.mxu1 %v1265_v51 }
  0xf7   : > { %v443_v19 = vadd.f32 %v1664_v3, %v442_v18  ;;  %1144 = vmatprep.mubr.f32.mxu1 %v503_v14 }
  0xf8   : > { %1145 = vmatmul.mubr.f32.gmra.mrb[2].mxu1 %v504_v16  ;;  %v506_v22 = vmax.f32 %v448_v17, 0.0 }
  0xf9   : > { %v505_v20 = vmax.f32 %v443_v19, 0.0  ;;  %v1096_v21 = vpop.f32.mrb[6].mxu0  ;;  %1302 = vmatpush3.bf16.msra.mxu1 %v1265_v51 }
  0xfa   : > { %v458_v23 = vadd.f32 %v1096_v21, %v1664_v3  ;;  %v452_v24 = vpop.f32.mrb[7].mxu0  ;;  %1295 = vmatprep.subr.bf16.mxu1 %v1269_v54 }
  0xfb   : > { %v453_v25 = vadd.f32 %v1664_v3, %v452_v24  ;;  %1147 = vmatprep.mubr.f32.mxu1 %v505_v20 }
  0xfc   : > { %1148 = vmatmul.mubr.f32.gmra.mrb[4].mxu1 %v506_v22  ;;  %v508_v28 = vmax.f32 %v458_v23, 0.0 }
  0xfd   : > { %v507_v26 = vmax.f32 %v453_v25, 0.0  ;;  %v1099_v27 = vpop.f32.mrb[8].mxu0  ;;  %1303 = vmatpush3.bf16.msra.mxu1 %v1269_v54  ;;  %v1289_v54 = vpack.c.bf16 %v716_v53, %v715_v52 }
  0xfe   : > { %v468_v29 = vadd.f32 %v1099_v27, %v1664_v3  ;;  %v462_v30 = vpop.f32.mrb[9].mxu0  ;;  %1296 = vmatprep.subr.bf16.mxu1 %v1627_v57 }
  0xff   : > { %v463_v31 = vadd.f32 %v1664_v3, %v462_v30  ;;  %1150 = vmatprep.mubr.f32.mxu1 %v507_v26  ;;  %1290 = vmatprep.subr.bf16.mxu0 %v1289_v54 }
 0x100   : > { %1151 = vmatmul.mubr.f32.gmra.mrb[6].mxu1 %v508_v28  ;;  %v510_v34 = vmax.f32 %v468_v29, 0.0  ;;  %1292 = vmatpush3.bf16.msra.mxu0 %v1289_v54 }
 0x101   : > { %v509_v32 = vmax.f32 %v463_v31, 0.0  ;;  %v1102_v33 = vpop.f32.mrb[10].mxu0  ;;  %1304 = vmatpush3.bf16.msra.mxu1 %v1627_v57 }
 0x102   : > { %v478_v35 = vadd.f32 %v1102_v33, %v1664_v3  ;;  %v472_v36 = vpop.f32.mrb[11].mxu0  ;;  %1297 = vmatprep.subr.bf16.mxu1 %v1636_v60 }
 0x103   : > { %v473_v37 = vadd.f32 %v1664_v3, %v472_v36  ;;  %1153 = vmatprep.mubr.f32.mxu1 %v509_v32 }
 0x104   : > { %1154 = vmatmul.mubr.f32.gmra.mrb[8].mxu1 %v510_v34  ;;  %v512_v40 = vmax.f32 %v478_v35, 0.0 }
 0x105   : > { %v511_v38 = vmax.f32 %v473_v37, 0.0  ;;  %v1105_v39 = vpop.f32.mrb[12].mxu0  ;;  %1305 = vmatpush3.bf16.msra.mxu1 %v1636_v60 }
 0x106   : > { %v488_v41 = vadd.f32 %v1105_v39, %v1664_v3  ;;  %v482_v42 = vpop.f32.mrb[13].mxu0  ;;  %1298 = vmatprep.subr.bf16.mxu1 %v1646_v63 }
 0x107   : > { %v483_v43 = vadd.f32 %v1664_v3, %v482_v42  ;;  %1156 = vmatprep.mubr.f32.mxu1 %v511_v38 }
 0x108   : > { %1157 = vmatmul.mubr.f32.gmra.mrb[10].mxu1 %v512_v40  ;;  %v514_v46 = vmax.f32 %v488_v41, 0.0  ;;  %v986_v40 = vld [vmem:[%s1781_s6] ss:$0 sm:$0xff] }
 0x109   : > { %v513_v44 = vmax.f32 %v483_v43, 0.0  ;;  %v1108_v45 = vpop.f32.mrb[14].mxu0  ;;  %1306 = vmatpush3.bf16.msra.mxu1 %v1646_v63 }
 0x10a   : > { %v498_v47 = vadd.f32 %v1108_v45, %v1664_v3  ;;  %v492_v48 = vpop.f32.mrb[15].mxu0  ;;  %1299 = vmatprep.subr.bf16.mxu1 %v1656_v2 }
 0x10b   : > { %v493_v49 = vadd.f32 %v1664_v3, %v492_v48  ;;  %1159 = vmatprep.mubr.f32.mxu1 %v513_v44 }
 0x10c   : > { %1160 = vmatmul.mubr.f32.gmra.mrb[12].mxu1 %v514_v46  ;;  %v516_v51 = vmax.f32 %v498_v47, 0.0 }
 0x10d   : > { %v515_v50 = vmax.f32 %v493_v49, 0.0  ;;  %1307 = vmatpush3.bf16.msra.mxu1 %v1656_v2 }
 0x10e   : > { %1300 = vmatprep.subr.bf16.mxu1 %v1289_v54 }
 0x10f   : > { %1162 = vmatprep.mubr.f32.mxu1 %v515_v50 }
 0x110   : > { %1163 = vmatmul.mubr.f32.gmra.mrb[14].mxu1 %v516_v51 }
 0x111   : > { %1308 = vmatpush3.bf16.msra.mxu1 %v1289_v54 }
 0x1c7   : > { %v1143_v56 = vpop.f32.mrb[0].mxu1 }
 0x1c8   : > { %v612_v57 = vadd.f32 %v1143_v56, %v985_v55  ;;  %v606_v58 = vpop.f32.mrb[1].mxu1 }
 0x1c9   : > { %v607_v59 = vadd.f32 %v985_v55, %v606_v58 }
 0x1ca   : > { %v686_v62 = vmax.f32 %v612_v57, 0.0 }
 0x1cb   : > { %v685_v60 = vmax.f32 %v607_v59, 0.0  ;;  %v1146_v61 = vpop.f32.mrb[2].mxu1 }
 0x1cc   : > { %v622_v63 = vadd.f32 %v1146_v61, %v985_v55  ;;  %v616_v0 = vpop.f32.mrb[3].mxu1 }
 0x1cd   : > { %v617_v1 = vadd.f32 %v985_v55, %v616_v0  ;;  %1197 = vmatprep.mubr.f32.mxu0 %v685_v60 }
 0x1ce   : > { %1198 = vmatmul.mubr.f32.vlgmr.msra.gmra.mrb[16].mxu0 %v686_v62  ;;  %v688_v4 = vmax.f32 %v622_v63, 0.0 }
 0x1cf   : > { %v687_v2 = vmax.f32 %v617_v1, 0.0  ;;  %v1149_v3 = vpop.f32.mrb[4].mxu1 }
 0x1d0   : > { %v632_v5 = vadd.f32 %v1149_v3, %v985_v55  ;;  %v626_v6 = vpop.f32.mrb[5].mxu1 }
 0x1d1   : > { %v627_v7 = vadd.f32 %v985_v55, %v626_v6  ;;  %1200 = vmatprep.mubr.f32.mxu0 %v687_v2 }
 0x1d2   : > { %1201 = vmatmul.mubr.f32.gmra.mrb[18].mxu0 %v688_v4  ;;  %v690_v10 = vmax.f32 %v632_v5, 0.0 }
 0x1d3   : > { %v689_v8 = vmax.f32 %v627_v7, 0.0  ;;  %v1152_v9 = vpop.f32.mrb[6].mxu1 }
 0x1d4   : > { %v642_v11 = vadd.f32 %v1152_v9, %v985_v55  ;;  %v636_v12 = vpop.f32.mrb[7].mxu1 }
 0x1d5   : > { %v637_v13 = vadd.f32 %v985_v55, %v636_v12  ;;  %1203 = vmatprep.mubr.f32.mxu0 %v689_v8 }
 0x1d6   : > { %1204 = vmatmul.mubr.f32.gmra.mrb[20].mxu0 %v690_v10  ;;  %v692_v16 = vmax.f32 %v642_v11, 0.0 }
 0x1d7   : > { %v691_v14 = vmax.f32 %v637_v13, 0.0  ;;  %v1155_v15 = vpop.f32.mrb[8].mxu1 }
 0x1d8   : > { %v652_v17 = vadd.f32 %v1155_v15, %v985_v55  ;;  %v646_v18 = vpop.f32.mrb[9].mxu1 }
 0x1d9   : > { %v647_v19 = vadd.f32 %v985_v55, %v646_v18  ;;  %1206 = vmatprep.mubr.f32.mxu0 %v691_v14 }
 0x1da   : > { %1207 = vmatmul.mubr.f32.gmra.mrb[22].mxu0 %v692_v16  ;;  %v694_v22 = vmax.f32 %v652_v17, 0.0 }
 0x1db   : > { %v693_v20 = vmax.f32 %v647_v19, 0.0  ;;  %v1158_v21 = vpop.f32.mrb[10].mxu1 }
 0x1dc   : > { %v662_v23 = vadd.f32 %v1158_v21, %v985_v55  ;;  %v656_v24 = vpop.f32.mrb[11].mxu1 }
 0x1dd   : > { %v657_v25 = vadd.f32 %v985_v55, %v656_v24  ;;  %1209 = vmatprep.mubr.f32.mxu0 %v693_v20 }
 0x1de   : > { %1210 = vmatmul.mubr.f32.gmra.mrb[24].mxu0 %v694_v22  ;;  %v696_v28 = vmax.f32 %v662_v23, 0.0 }
 0x1df   : > { %v695_v26 = vmax.f32 %v657_v25, 0.0  ;;  %v1161_v27 = vpop.f32.mrb[12].mxu1 }
 0x1e0   : > { %v672_v29 = vadd.f32 %v1161_v27, %v985_v55  ;;  %v666_v30 = vpop.f32.mrb[13].mxu1 }
 0x1e1   : > { %v667_v31 = vadd.f32 %v985_v55, %v666_v30  ;;  %1212 = vmatprep.mubr.f32.mxu0 %v695_v26 }
 0x1e2   : > { %1213 = vmatmul.mubr.f32.gmra.mrb[26].mxu0 %v696_v28  ;;  %v698_v34 = vmax.f32 %v672_v29, 0.0 }
 0x1e3   : > { %v697_v32 = vmax.f32 %v667_v31, 0.0  ;;  %v1164_v33 = vpop.f32.mrb[14].mxu1 }
 0x1e4   : > { %v682_v35 = vadd.f32 %v1164_v33, %v985_v55  ;;  %v676_v36 = vpop.f32.mrb[15].mxu1 }
 0x1e5   : > { %v677_v37 = vadd.f32 %v985_v55, %v676_v36  ;;  %1215 = vmatprep.mubr.f32.mxu0 %v697_v32 }
 0x1e6   : > { %1216 = vmatmul.mubr.f32.gmra.mrb[28].mxu0 %v698_v34  ;;  %v700_v39 = vmax.f32 %v682_v35, 0.0 }
 0x1e7   : > { %v699_v38 = vmax.f32 %v677_v37, 0.0 }
 0x1e9   : > { %1218 = vmatprep.mubr.f32.mxu1 %v699_v38 }
 0x1ea   : > { %1219 = vmatmul.mubr.f32.vlgmr.msra.gmra.mrb[16].mxu1 %v700_v39 }
 0x2a1   : > { %v1199_v41 = vpop.f32.mrb[16].mxu0 }
 0x2a2   : > { %v796_v42 = vadd.f32 %v1199_v41, %v986_v40  ;;  %v790_v43 = vpop.f32.mrb[17].mxu0 }
 0x2a3   : > { %v791_v44 = vadd.f32 %v986_v40, %v790_v43 }
 0x2a4   : > { %870 = vst [vmem:[%s1705_s15 + $0x8] sm:$0xff] %v796_v42 }
 0x2a5   : > { %869 = vst [vmem:[%s1705_s15] sm:$0xff] %v791_v44  ;;  %v1202_v45 = vpop.f32.mrb[18].mxu0 }
 0x2a6   : > { %v806_v46 = vadd.f32 %v1202_v45, %v986_v40  ;;  %v800_v47 = vpop.f32.mrb[19].mxu0 }
 0x2a7   : > { %v801_v48 = vadd.f32 %v986_v40, %v800_v47 }
 0x2a8   : > { %872 = vst [vmem:[%s1705_s15 + $0x18] sm:$0xff] %v806_v46 }
 0x2a9   : > { %871 = vst [vmem:[%s1705_s15 + $0x10] sm:$0xff] %v801_v48  ;;  %v1205_v49 = vpop.f32.mrb[20].mxu0 }
 0x2aa   : > { %v816_v50 = vadd.f32 %v1205_v49, %v986_v40  ;;  %v810_v51 = vpop.f32.mrb[21].mxu0 }
 0x2ab   : > { %v811_v52 = vadd.f32 %v986_v40, %v810_v51 }
 0x2ac   : > { %874 = vst [vmem:[%s1705_s15 + $0x28] sm:$0xff] %v816_v50 }
 0x2ad   : > { %873 = vst [vmem:[%s1705_s15 + $0x20] sm:$0xff] %v811_v52  ;;  %v1208_v53 = vpop.f32.mrb[22].mxu0 }
 0x2ae   : > { %v826_v54 = vadd.f32 %v1208_v53, %v986_v40  ;;  %v820_v55 = vpop.f32.mrb[23].mxu0 }
 0x2af   : > { %v821_v56 = vadd.f32 %v986_v40, %v820_v55 }
 0x2b0   : > { %876 = vst [vmem:[%s1705_s15 + $0x38] sm:$0xff] %v826_v54 }
 0x2b1   : > { %875 = vst [vmem:[%s1705_s15 + $0x30] sm:$0xff] %v821_v56  ;;  %v1211_v57 = vpop.f32.mrb[24].mxu0 }
 0x2b2   : > { %v836_v58 = vadd.f32 %v1211_v57, %v986_v40  ;;  %v830_v59 = vpop.f32.mrb[25].mxu0 }
 0x2b3   : > { %v831_v60 = vadd.f32 %v986_v40, %v830_v59 }
 0x2b4   : > { %878 = vst [vmem:[%s1705_s15 + $0x48] sm:$0xff] %v836_v58 }
 0x2b5   : > { %877 = vst [vmem:[%s1705_s15 + $0x40] sm:$0xff] %v831_v60  ;;  %v1214_v61 = vpop.f32.mrb[26].mxu0 }
 0x2b6   : > { %v846_v62 = vadd.f32 %v1214_v61, %v986_v40  ;;  %v840_v63 = vpop.f32.mrb[27].mxu0 }
 0x2b7   : > { %v841_v0 = vadd.f32 %v986_v40, %v840_v63 }
 0x2b8   : > { %880 = vst [vmem:[%s1705_s15 + $0x58] sm:$0xff] %v846_v62 }
 0x2b9   : > { %879 = vst [vmem:[%s1705_s15 + $0x50] sm:$0xff] %v841_v0  ;;  %v1217_v1 = vpop.f32.mrb[28].mxu0 }
 0x2ba   : > { %v856_v2 = vadd.f32 %v1217_v1, %v986_v40  ;;  %v850_v3 = vpop.f32.mrb[29].mxu0 }
 0x2bb   : > { %v851_v4 = vadd.f32 %v986_v40, %v850_v3 }
 0x2bc   : > { %882 = vst [vmem:[%s1705_s15 + $0x68] sm:$0xff] %v856_v2 }
 0x2bd   : > { %881 = vst [vmem:[%s1705_s15 + $0x60] sm:$0xff] %v851_v4  ;;  %v1220_v5 = vpop.f32.mrb[16].mxu1 }
 0x2be   : > { %v866_v6 = vadd.f32 %v1220_v5, %v986_v40  ;;  %v860_v7 = vpop.f32.mrb[17].mxu1 }
 0x2bf   : > { %v861_v8 = vadd.f32 %v986_v40, %v860_v7 }
 0x2c0   : > { %884 = vst [vmem:[%s1705_s15 + $0x78] sm:$0xff] %v866_v6 }
 0x2c1   : > { %883 = vst [vmem:[%s1705_s15 + $0x70] sm:$0xff] %v861_v8 }
 0x2c2   : > { %1363 = shalt.err (!%p1360_p3)
}
 0x2c3   : > { %s1364_s9 = scalar_lea.hbm %s1726_s21, 2048  ;;  %s1368_s14 = scalar_lea.hbm %s1782_s7, 4096 }
 0x2c4   : > { %p1365_p4 = scmp.ne.s32.totalorder %s1726_s21, %s1364_s9  ;;  %p1369_p9 = scmp.lt.u32.totalorder %s1726_s21, %s1782_s7 }
 0x2c5   : > { %p1370_p10 = scmp.lt.u32.totalorder %s1368_s14, %s1364_s9  ;;  %p1372_p12 = scmp.lt.u32.totalorder %s1364_s9, %s1726_s21 }
 0x2c6   : > { %p1366_p7 = pnand %p1365_p4, %p1495_p5 }
 0x2c7   : > { %p1371_p11 = por %p1370_p10, %p1369_p9 }
 0x2c8   : > { %p1367_p8 = pneg %p1366_p7 }
 0x2c9   : > { %p1373_p13 = por %p1372_p12, %p1371_p11 }
 0x2cb   : > { %p1374_p0 = pnand %p1373_p13, %p1367_p8 }
 0x2cd   : > { %1377 = shalt.err (!%p1374_p0)
}
 0x2ce   : > { %s1415_s18 = smov 128   ;;  %s1416_s20 = smov 8  }
 0x2cf   : > { %1309 = dma.vmem_to_hbm [thread:$0]  (%p1495_p5), %s1728_s17, 2048, %s1726_s21, %s1734_s28, %s1415_s18, %s1415_s18, %s1416_s20  }
 0x2d0 PF: > { %p1315_p1 = scmp.ge.s32.totalorder %s1412_s27, 2  ;;  %s914_s29 = sand.u32 1, %s1400_s24  }
 0x2d1   : > { %s915_s22 = scalar_lea.sflag [#allocation3], %s914_s29 }
 0x2d2   : > { %p1312_p2 = pnand %p1315_p1, %p1499_p6 }
 0x2d4   : > { %1395 = dma.done.wait (!%p1312_p2), %s915_s22, 2048  }
 0x2d5   : > { %1397 = vsyncadd (!%p1312_p2), %s915_s22, 4294965248  ;;  %p17_p3 = scmp.ge.s32.totalorder %s1482_s30, 4   ;;  %s1785_s24 = smov %s1404_s25 }
 0x2d6   : > { %s1786_s25 = smov %s1408_s26  ;;  %s1787_s26 = smov %s1493_s10 }
 0x2d7   : > { %s1788_s27 = smov %s1482_s30  ;;  %19 = sbr.rel (!%p17_p3) target bundleno = 3 (0x3), region = 83 }
 0x2de   :  { %920 = vsyncpa [#allocation3], 1 }
 0x2df   :  { %922 = vsyncpa [#allocation3 + $0x1], 1 }

</bundles_post_ra>
